<compile_context>
chip_gen: v6e
topology: v6e:2x2x1
jax: 0.10.0
libtpu: 0.0.40
codegen_flags: <defaults>
</compile_context>

<pallas_src>
import functools

import jax
import jax.numpy as jnp
from jax.experimental import pallas as pl
from jax.experimental.pallas import tpu as pltpu


def _round_up(x, m):
    return (x + m - 1) // m * m


def _conv_bn_kernel(ph_ref, w_ref, b_ref, o_ref, col_ref, *,
                    KH, KW, stride, Cin, Cin_pad, Wp, Lout_pad, nb):
    # ph_ref : (stride*stride, nb, Cin, Lp)   stride-phases of the padded images
    # w_ref  : (cout_tile, KH*KW*Cin_pad)     BN-folded weight, stacked-K layout
    # b_ref  : (cout_tile, 1)                 BN-folded bias (f32)
    # o_ref  : (nb, cout_tile, Lout_pad)      lane-dense NC(Ho*Wp pad128) output
    # col_ref: (KH*KW*Cin_pad, nb*Lout_pad)   VMEM scratch: implicit im2col
    dt = col_ref.dtype
    pad = Cin_pad - Cin
    if pad:
        zpad = jnp.zeros((pad, Lout_pad), dt)          # hoisted, written per tap
    for b in range(nb):
        c0 = b * Lout_pad
        for kh in range(KH):
            for kw in range(KW):
                p = (kh % stride) * stride + (kw % stride)   # which phase
                s = (kh // stride) * Wp + (kw // stride)     # static lane offset
                r0 = (kh * KW + kw) * Cin_pad                # aligned row block
                col_ref[pl.ds(r0, Cin), pl.ds(c0, Lout_pad)] = \
                    ph_ref[p, b, :, pl.ds(s, Lout_pad)]
                if pad:
                    col_ref[pl.ds(r0 + Cin, pad), pl.ds(c0, Lout_pad)] = zpad
    # One stacked-K matmul: contraction K = KH*KW*Cin_pad, N-dim = nb*Lout_pad.
    res = jnp.dot(w_ref[...], col_ref[...],
                  preferred_element_type=jnp.float32)        # (cout_tile, nb*Lpad)
    res = res + b_ref[...]                                   # f32 epilogue
    for b in range(nb):
        o_ref[b] = res[:, b * Lout_pad:(b + 1) * Lout_pad].astype(o_ref.dtype)


def conv_branch_forward(x_nchw, conv_w, gamma, beta, running_mean, running_var,
                        *, stride=2, padding=1, eps=1e-5,
                        compute_dtype=jnp.float32, nb=None, cout_tile=None):
    """ConvBranch.forward: Conv2d(k, stride, pad, bias=False) + BatchNorm2d (eval).

    x_nchw : (N, Cin, H, W)      float32
    conv_w : (Cout, Cin, KH, KW) float32 (PyTorch layout)
    returns: (N, Cout, Ho, Wo)   float32
    """
    N, Cin, H, W = x_nchw.shape
    Cout, Cin_w, KH, KW = conv_w.shape
    assert Cin_w == Cin, "groups != 1 not supported"

    Ho = (H + 2 * padding - KH) // stride + 1
    Wo = (W + 2 * padding - KW) // stride + 1
    dh, dw = (KH - 1) // stride, (KW - 1) // stride
    Hp, Wp = Ho + dh, Wo + dw                    # phase-image extents
    Lout = Ho * Wp                               # flattened spatial extent
    Lout_pad = _round_up(Lout, 128)              # lane-dense output / matmul N-dim
    max_off = dh * Wp + dw                       # largest static tap lane offset
    Lp = Lout_pad + max_off                      # keeps every tap slice in-bounds

    pad_b = stride * Hp - H - padding
    pad_r = stride * Wp - W - padding
    assert pad_b >= 0 and pad_r >= 0, "unsupported stride/padding/kernel combo"

    itemsize = jnp.dtype(compute_dtype).itemsize
    sub_pack = 8 * 4 // itemsize                 # sublane packing: 8 f32 / 16 bf16
    Cin_pad = _round_up(Cin, sub_pack)
    Kc_pad = KH * KW * Cin_pad

    # ---- tiling choices -------------------------------------------------------
    if cout_tile is None:
        cout_tile = 128 if (Cout > 256 and Cout % 128 == 0) else Cout
    if nb is None:
        nb = 1
        for cand in range(2, N + 1):             # pack images per step when tiny
            if N % cand:
                continue
            if cand * Lout_pad > 2048:           # keep matmul N-dim / VMEM modest
                break
            if N // cand >= 2:                   # keep >=2 steps (v7x: 2 TCs)
                nb = cand
    assert N % nb == 0 and Cout % cout_tile == 0

    # ---- wrapper glue: stays NCHW, ~1x input volume (no im2col, no transposes) --
    x = x_nchw.astype(compute_dtype)             # cast first: halves pad/stack HBM
    xp = jnp.pad(x, ((0, 0), (0, 0), (padding, pad_b), (padding, pad_r)))
    phases = jnp.stack([xp[:, :, a::stride, b::stride]
                        for a in range(stride) for b in range(stride)], axis=0)
    phases = phases.reshape(stride * stride, N, Cin, Hp * Wp)
    phases = jnp.pad(phases, ((0, 0), (0, 0), (0, 0), (0, Lp - Hp * Wp)))

    # ---- fold BatchNorm (eval) into the conv weight and a bias ----------------
    scale = gamma * jax.lax.rsqrt(running_var + eps)              # (Cout,)
    w_folded = conv_w * scale[:, None, None, None]                # (Cout,Cin,KH,KW)
    w_t = jnp.transpose(w_folded, (0, 2, 3, 1))                   # (Cout,KH,KW,Cin)
    w_t = jnp.pad(w_t, ((0, 0), (0, 0), (0, 0), (0, Cin_pad - Cin)))
    w2d = w_t.reshape(Cout, Kc_pad).astype(compute_dtype)         # stacked-K layout
    bias = (beta - running_mean * scale).reshape(Cout, 1).astype(jnp.float32)

    kernel = functools.partial(_conv_bn_kernel, KH=KH, KW=KW, stride=stride,
                               Cin=Cin, Cin_pad=Cin_pad, Wp=Wp,
                               Lout_pad=Lout_pad, nb=nb)

    # ---- VMEM budget (double-buffered ins/outs + scratch) ----------------------
    phase_blk = stride * stride * nb * Cin * Lp * itemsize
    w_blk = cout_tile * Kc_pad * itemsize
    out_blk = nb * cout_tile * Lout_pad * 4
    col_blk = Kc_pad * nb * Lout_pad * itemsize
    vmem_need = 2 * (phase_blk + w_blk + cout_tile * 4 + out_blk) + col_blk
    cp_kwargs = dict(dimension_semantics=("parallel", "parallel"))
    if vmem_need > 24 * 1024 * 1024:
        cp_kwargs["vmem_limit_bytes"] = int(min(vmem_need * 3 // 2,
                                                60 * 1024 * 1024))

    out = pl.pallas_call(
        kernel,
        out_shape=jax.ShapeDtypeStruct((N, Cout, Lout_pad), jnp.float32),
        grid_spec=pltpu.PrefetchScalarGridSpec(
            num_scalar_prefetch=0,
            grid=(N // nb, Cout // cout_tile),
            in_specs=[
                pl.BlockSpec((stride * stride, nb, Cin, Lp),
                             lambda i, j: (0, i, 0, 0)),
                pl.BlockSpec((cout_tile, Kc_pad), lambda i, j: (j, 0)),
                pl.BlockSpec((cout_tile, 1), lambda i, j: (j, 0)),
            ],
            out_specs=pl.BlockSpec((nb, cout_tile, Lout_pad),
                                   lambda i, j: (i, j, 0)),
            scratch_shapes=[pltpu.VMEM((Kc_pad, nb * Lout_pad), compute_dtype)],
        ),
        compiler_params=pltpu.CompilerParams(**cp_kwargs),
    )(phases, w2d, bias)

    # crop lane padding + phase-pad column(s); NCHW out.
    return out[:, :, :Lout].reshape(N, Cout, Ho, Wp)[:, :, :, :Wo]


def _reference(x_nchw, conv_w, gamma, beta, mean, var, *, stride=2, padding=1,
               eps=1e-5):
    y = jax.lax.conv_general_dilated(
        x_nchw, conv_w,
        window_strides=(stride, stride),
        padding=((padding, padding), (padding, padding)),
        dimension_numbers=("NCHW", "OIHW", "NCHW"))
    scale = (gamma / jnp.sqrt(var + eps)).reshape(1, -1, 1, 1)
    shift = (beta - mean * gamma / jnp.sqrt(var + eps)).reshape(1, -1, 1, 1)
    return y * scale + shift


if __name__ == "__main__":
    # Module config: in_channels=4, out_channels=num_features=8,
    # kernel_size=3, stride=2, padding=1, groups=1, bias=False, ignore=False.
    N, Cin, H, W = 2, 4, 16, 16
    Cout = 8
    KH = KW = 3

    key = jax.random.PRNGKey(0)
    k_x, k_w, k_g, k_b, k_m, k_v = jax.random.split(key, 6)

    x = jax.random.normal(k_x, (N, Cin, H, W), dtype=jnp.float32)
    conv_w = jax.random.normal(k_w, (Cout, Cin, KH, KW), dtype=jnp.float32) * 0.1
    gamma = jax.random.normal(k_g, (Cout,), dtype=jnp.float32) * 0.1 + 1.0
    beta = jax.random.normal(k_b, (Cout,), dtype=jnp.float32) * 0.1
    running_mean = jax.random.normal(k_m, (Cout,), dtype=jnp.float32) * 0.1
    running_var = jnp.abs(jax.random.normal(k_v, (Cout,), dtype=jnp.float32)) + 0.5

    ref = _reference(x, conv_w, gamma, beta, running_mean, running_var)

    # f32 operand path.
    out = conv_branch_forward(x, conv_w, gamma, beta, running_mean, running_var)
    out = jax.block_until_ready(out)
    assert out.shape == (N, Cout, H // 2, W // 2), out.shape
    assert jnp.allclose(out, ref, atol=1e-3, rtol=1e-3), \
        float(jnp.max(jnp.abs(out - ref)))

    # bf16 MXU-operand path (f32 accumulation + f32 epilogue), recommended on
    # v6e/v7x; checked against the f32 reference with a bf16-appropriate tolerance.
    out_bf16 = conv_branch_forward(x, conv_w, gamma, beta, running_mean,
                                   running_var, compute_dtype=jnp.bfloat16)
    out_bf16 = jax.block_until_ready(out_bf16)
    assert out_bf16.shape == (N, Cout, H // 2, W // 2), out_bf16.shape
    assert jnp.allclose(out_bf16, ref, atol=5e-2, rtol=5e-2), \
        float(jnp.max(jnp.abs(out_bf16 - ref)))

    print("KERNEL_OK")
</pallas_src>

<mosaic_0001>
module attributes {stable_mosaic.version = 11 : i64} {
  func.func @_conv_bn_kernel(%arg0: i32, %arg1: i32, %arg2: memref<4x1x4x138xf32, #tpu.memory_space<vmem>>, %arg3: memref<8x72xf32, #tpu.memory_space<vmem>>, %arg4: memref<8x1xf32, #tpu.memory_space<vmem>>, %arg5: memref<1x8x128xf32, #tpu.memory_space<vmem>>, %arg6: memref<72x128xf32, #tpu.memory_space<vmem>>) attributes {dimension_semantics = [#tpu.dimension_semantics<parallel>, #tpu.dimension_semantics<parallel>], iteration_bounds = array<i64: 2, 1>, scalar_prefetch = 0 : i64, scratch_operands = 1 : i64, tpu.core_type = #tpu.core_type<tc>, window_params = [{transform_indices = @transform_0, window_bounds = array<i64: 4, 1, 4, 138>}, {transform_indices = @transform_1, window_bounds = array<i64: 8, 72>}, {transform_indices = @transform_2, window_bounds = array<i64: 8, 1>}, {transform_indices = @transform_3, window_bounds = array<i64: 1, 8, 128>}]} {
    %cst = arith.constant 0.000000e+00 : f32
    %0 = vector.broadcast %cst : f32 to vector<4x128xf32>
    %c0 = arith.constant 0 : index
    %c0_0 = arith.constant 0 : index
    %c0_1 = arith.constant 0 : index
    %c0_2 = arith.constant 0 : index
    %1 = vector.load %arg2[%c0, %c0_0, %c0_1, %c0_2] : memref<4x1x4x138xf32, #tpu.memory_space<vmem>>, vector<1x1x4x128xf32>
    %2 = vector.shape_cast %1 : vector<1x1x4x128xf32> to vector<4x128xf32>
    %c0_3 = arith.constant 0 : index
    %c0_4 = arith.constant 0 : index
    %3 = vector.load %arg6[%c0_3, %c0_4] : memref<72x128xf32, #tpu.memory_space<vmem>>, vector<4x128xf32>
    tpu.vector_store %arg6[%c0_3, %c0_4], %2 {strides = array<i32>} : memref<72x128xf32, #tpu.memory_space<vmem>>, vector<4x128xf32>,
    %c4 = arith.constant 4 : index
    %c0_5 = arith.constant 0 : index
    %4 = vector.load %arg6[%c4, %c0_5] : memref<72x128xf32, #tpu.memory_space<vmem>>, vector<4x128xf32>
    tpu.vector_store %arg6[%c4, %c0_5], %0 {strides = array<i32>} : memref<72x128xf32, #tpu.memory_space<vmem>>, vector<4x128xf32>,
    %c1 = arith.constant 1 : index
    %c0_6 = arith.constant 0 : index
    %c0_7 = arith.constant 0 : index
    %c0_8 = arith.constant 0 : index
    %5 = vector.load %arg2[%c1, %c0_6, %c0_7, %c0_8] : memref<4x1x4x138xf32, #tpu.memory_space<vmem>>, vector<1x1x4x128xf32>
    %6 = vector.shape_cast %5 : vector<1x1x4x128xf32> to vector<4x128xf32>
    %c8 = arith.constant 8 : index
    %c0_9 = arith.constant 0 : index
    %7 = vector.load %arg6[%c8, %c0_9] : memref<72x128xf32, #tpu.memory_space<vmem>>, vector<4x128xf32>
    tpu.vector_store %arg6[%c8, %c0_9], %6 {strides = array<i32>} : memref<72x128xf32, #tpu.memory_space<vmem>>, vector<4x128xf32>,
    %c12 = arith.constant 12 : index
    %c0_10 = arith.constant 0 : index
    %8 = vector.load %arg6[%c12, %c0_10] : memref<72x128xf32, #tpu.memory_space<vmem>>, vector<4x128xf32>
    tpu.vector_store %arg6[%c12, %c0_10], %0 {strides = array<i32>} : memref<72x128xf32, #tpu.memory_space<vmem>>, vector<4x128xf32>,
    %c0_11 = arith.constant 0 : index
    %c0_12 = arith.constant 0 : index
    %c0_13 = arith.constant 0 : index
    %c1_14 = arith.constant 1 : index
    %9 = vector.load %arg2[%c0_11, %c0_12, %c0_13, %c1_14] : memref<4x1x4x138xf32, #tpu.memory_space<vmem>>, vector<1x1x4x128xf32>
    %10 = vector.shape_cast %9 : vector<1x1x4x128xf32> to vector<4x128xf32>
    %c16 = arith.constant 16 : index
    %c0_15 = arith.constant 0 : index
    %11 = vector.load %arg6[%c16, %c0_15] : memref<72x128xf32, #tpu.memory_space<vmem>>, vector<4x128xf32>
    tpu.vector_store %arg6[%c16, %c0_15], %10 {strides = array<i32>} : memref<72x128xf32, #tpu.memory_space<vmem>>, vector<4x128xf32>,
    %c20 = arith.constant 20 : index
    %c0_16 = arith.constant 0 : index
    %12 = vector.load %arg6[%c20, %c0_16] : memref<72x128xf32, #tpu.memory_space<vmem>>, vector<4x128xf32>
    tpu.vector_store %arg6[%c20, %c0_16], %0 {strides = array<i32>} : memref<72x128xf32, #tpu.memory_space<vmem>>, vector<4x128xf32>,
    %c2 = arith.constant 2 : index
    %c0_17 = arith.constant 0 : index
    %c0_18 = arith.constant 0 : index
    %c0_19 = arith.constant 0 : index
    %13 = vector.load %arg2[%c2, %c0_17, %c0_18, %c0_19] : memref<4x1x4x138xf32, #tpu.memory_space<vmem>>, vector<1x1x4x128xf32>
    %14 = vector.shape_cast %13 : vector<1x1x4x128xf32> to vector<4x128xf32>
    %c24 = arith.constant 24 : index
    %c0_20 = arith.constant 0 : index
    %15 = vector.load %arg6[%c24, %c0_20] : memref<72x128xf32, #tpu.memory_space<vmem>>, vector<4x128xf32>
    tpu.vector_store %arg6[%c24, %c0_20], %14 {strides = array<i32>} : memref<72x128xf32, #tpu.memory_space<vmem>>, vector<4x128xf32>,
    %c28 = arith.constant 28 : index
    %c0_21 = arith.constant 0 : index
    %16 = vector.load %arg6[%c28, %c0_21] : memref<72x128xf32, #tpu.memory_space<vmem>>, vector<4x128xf32>
    tpu.vector_store %arg6[%c28, %c0_21], %0 {strides = array<i32>} : memref<72x128xf32, #tpu.memory_space<vmem>>, vector<4x128xf32>,
    %c3 = arith.constant 3 : index
    %c0_22 = arith.constant 0 : index
    %c0_23 = arith.constant 0 : index
    %c0_24 = arith.constant 0 : index
    %17 = vector.load %arg2[%c3, %c0_22, %c0_23, %c0_24] : memref<4x1x4x138xf32, #tpu.memory_space<vmem>>, vector<1x1x4x128xf32>
    %18 = vector.shape_cast %17 : vector<1x1x4x128xf32> to vector<4x128xf32>
    %c32 = arith.constant 32 : index
    %c0_25 = arith.constant 0 : index
    %19 = vector.load %arg6[%c32, %c0_25] : memref<72x128xf32, #tpu.memory_space<vmem>>, vector<4x128xf32>
    tpu.vector_store %arg6[%c32, %c0_25], %18 {strides = array<i32>} : memref<72x128xf32, #tpu.memory_space<vmem>>, vector<4x128xf32>,
    %c36 = arith.constant 36 : index
    %c0_26 = arith.constant 0 : index
    %20 = vector.load %arg6[%c36, %c0_26] : memref<72x128xf32, #tpu.memory_space<vmem>>, vector<4x128xf32>
    tpu.vector_store %arg6[%c36, %c0_26], %0 {strides = array<i32>} : memref<72x128xf32, #tpu.memory_space<vmem>>, vector<4x128xf32>,
    %c2_27 = arith.constant 2 : index
    %c0_28 = arith.constant 0 : index
    %c0_29 = arith.constant 0 : index
    %c1_30 = arith.constant 1 : index
    %21 = vector.load %arg2[%c2_27, %c0_28, %c0_29, %c1_30] : memref<4x1x4x138xf32, #tpu.memory_space<vmem>>, vector<1x1x4x128xf32>
    %22 = vector.shape_cast %21 : vector<1x1x4x128xf32> to vector<4x128xf32>
    %c40 = arith.constant 40 : index
    %c0_31 = arith.constant 0 : index
    %23 = vector.load %arg6[%c40, %c0_31] : memref<72x128xf32, #tpu.memory_space<vmem>>, vector<4x128xf32>
    tpu.vector_store %arg6[%c40, %c0_31], %22 {strides = array<i32>} : memref<72x128xf32, #tpu.memory_space<vmem>>, vector<4x128xf32>,
    %c44 = arith.constant 44 : index
    %c0_32 = arith.constant 0 : index
    %24 = vector.load %arg6[%c44, %c0_32] : memref<72x128xf32, #tpu.memory_space<vmem>>, vector<4x128xf32>
    tpu.vector_store %arg6[%c44, %c0_32], %0 {strides = array<i32>} : memref<72x128xf32, #tpu.memory_space<vmem>>, vector<4x128xf32>,
    %c0_33 = arith.constant 0 : index
    %c0_34 = arith.constant 0 : index
    %c0_35 = arith.constant 0 : index
    %c9 = arith.constant 9 : index
    %25 = vector.load %arg2[%c0_33, %c0_34, %c0_35, %c9] : memref<4x1x4x138xf32, #tpu.memory_space<vmem>>, vector<1x1x4x128xf32>
    %26 = vector.shape_cast %25 : vector<1x1x4x128xf32> to vector<4x128xf32>
    %c48 = arith.constant 48 : index
    %c0_36 = arith.constant 0 : index
    %27 = vector.load %arg6[%c48, %c0_36] : memref<72x128xf32, #tpu.memory_space<vmem>>, vector<4x128xf32>
    tpu.vector_store %arg6[%c48, %c0_36], %26 {strides = array<i32>} : memref<72x128xf32, #tpu.memory_space<vmem>>, vector<4x128xf32>,
    %c52 = arith.constant 52 : index
    %c0_37 = arith.constant 0 : index
    %28 = vector.load %arg6[%c52, %c0_37] : memref<72x128xf32, #tpu.memory_space<vmem>>, vector<4x128xf32>
    tpu.vector_store %arg6[%c52, %c0_37], %0 {strides = array<i32>} : memref<72x128xf32, #tpu.memory_space<vmem>>, vector<4x128xf32>,
    %c1_38 = arith.constant 1 : index
    %c0_39 = arith.constant 0 : index
    %c0_40 = arith.constant 0 : index
    %c9_41 = arith.constant 9 : index
    %29 = vector.load %arg2[%c1_38, %c0_39, %c0_40, %c9_41] : memref<4x1x4x138xf32, #tpu.memory_space<vmem>>, vector<1x1x4x128xf32>
    %30 = vector.shape_cast %29 : vector<1x1x4x128xf32> to vector<4x128xf32>
    %c56 = arith.constant 56 : index
    %c0_42 = arith.constant 0 : index
    %31 = vector.load %arg6[%c56, %c0_42] : memref<72x128xf32, #tpu.memory_space<vmem>>, vector<4x128xf32>
    tpu.vector_store %arg6[%c56, %c0_42], %30 {strides = array<i32>} : memref<72x128xf32, #tpu.memory_space<vmem>>, vector<4x128xf32>,
    %c60 = arith.constant 60 : index
    %c0_43 = arith.constant 0 : index
    %32 = vector.load %arg6[%c60, %c0_43] : memref<72x128xf32, #tpu.memory_space<vmem>>, vector<4x128xf32>
    tpu.vector_store %arg6[%c60, %c0_43], %0 {strides = array<i32>} : memref<72x128xf32, #tpu.memory_space<vmem>>, vector<4x128xf32>,
    %c0_44 = arith.constant 0 : index
    %c0_45 = arith.constant 0 : index
    %c0_46 = arith.constant 0 : index
    %c10 = arith.constant 10 : index
    %33 = vector.load %arg2[%c0_44, %c0_45, %c0_46, %c10] : memref<4x1x4x138xf32, #tpu.memory_space<vmem>>, vector<1x1x4x128xf32>
    %34 = vector.shape_cast %33 : vector<1x1x4x128xf32> to vector<4x128xf32>
    %c64 = arith.constant 64 : index
    %c0_47 = arith.constant 0 : index
    %35 = vector.load %arg6[%c64, %c0_47] : memref<72x128xf32, #tpu.memory_space<vmem>>, vector<4x128xf32>
    tpu.vector_store %arg6[%c64, %c0_47], %34 {strides = array<i32>} : memref<72x128xf32, #tpu.memory_space<vmem>>, vector<4x128xf32>,
    %c68 = arith.constant 68 : index
    %c0_48 = arith.constant 0 : index
    %36 = vector.load %arg6[%c68, %c0_48] : memref<72x128xf32, #tpu.memory_space<vmem>>, vector<4x128xf32>
    tpu.vector_store %arg6[%c68, %c0_48], %0 {strides = array<i32>} : memref<72x128xf32, #tpu.memory_space<vmem>>, vector<4x128xf32>,
    %c0_49 = arith.constant 0 : index
    %c0_50 = arith.constant 0 : index
    %37 = vector.load %arg3[%c0_49, %c0_50] : memref<8x72xf32, #tpu.memory_space<vmem>>, vector<8x72xf32>
    %c0_51 = arith.constant 0 : index
    %c0_52 = arith.constant 0 : index
    %38 = vector.load %arg6[%c0_51, %c0_52] : memref<72x128xf32, #tpu.memory_space<vmem>>, vector<72x128xf32>
    %cst_53 = arith.constant dense<0.000000e+00> : vector<8x128xf32>
    %39 = tpu.matmul %37, %38, %cst_53 {dimension_numbers = #tpu.dot_dimension_numbers<[1], [0], [0], [1], [0, 0, 1, 1], [], []>} : vector<8x72xf32>, vector<72x128xf32>, vector<8x128xf32> -> vector<8x128xf32>
    %c0_54 = arith.constant 0 : index
    %c0_55 = arith.constant 0 : index
    %40 = vector.load %arg4[%c0_54, %c0_55] : memref<8x1xf32, #tpu.memory_space<vmem>>, vector<8x1xf32>
    %41 = vector.broadcast %40 : vector<8x1xf32> to vector<8x128xf32>
    %42 = arith.addf %39, %41 : vector<8x128xf32>
    %c0_56 = arith.constant 0 : index
    %c0_57 = arith.constant 0 : index
    %c0_58 = arith.constant 0 : index
    %43 = vector.load %arg5[%c0_56, %c0_57, %c0_58] : memref<1x8x128xf32, #tpu.memory_space<vmem>>, vector<1x8x128xf32>
    %44 = vector.shape_cast %43 : vector<1x8x128xf32> to vector<8x128xf32>
    %45 = vector.shape_cast %42 : vector<8x128xf32> to vector<1x8x128xf32>
    tpu.vector_store %arg5[%c0_56, %c0_57, %c0_58], %45 {strides = array<i32>} : memref<1x8x128xf32, #tpu.memory_space<vmem>>, vector<1x8x128xf32>,
    return
  }
  func.func @transform_0(%arg0: i32, %arg1: i32) -> (i32, i32, i32, i32) {
    %c0_i32 = arith.constant 0 : i32
    %c0_i32_0 = arith.constant 0 : i32
    %c0_i32_1 = arith.constant 0 : i32
    %c0_i32_2 = arith.constant 0 : i32
    return %c0_i32, %arg0, %c0_i32_0, %c0_i32_1 : i32, i32, i32, i32
  }
  func.func @transform_1(%arg0: i32, %arg1: i32) -> (i32, i32) {
    %c0_i32 = arith.constant 0 : i32
    %c0_i32_0 = arith.constant 0 : i32
    return %arg1, %c0_i32 : i32, i32
  }
  func.func @transform_2(%arg0: i32, %arg1: i32) -> (i32, i32) {
    %c0_i32 = arith.constant 0 : i32
    %c0_i32_0 = arith.constant 0 : i32
    return %arg1, %c0_i32 : i32, i32
  }
  func.func @transform_3(%arg0: i32, %arg1: i32) -> (i32, i32, i32) {
    %c0_i32 = arith.constant 0 : i32
    %c0_i32_0 = arith.constant 0 : i32
    return %arg0, %arg1, %c0_i32 : i32, i32, i32
  }
}

</mosaic_0001>

<bundles_post_ra>
// kernel: tpu_custom_call.1
= control target key start
LH: loop header
LB: loop body
LE: loop exit
PB: predicated region body
PF: predicated region fallthrough
CT: control target
= control target key end

     0   :  { %8 = vsyncpa [#allocation4], 0  ;;  %s966_s0 = inlined_call_operand.hbm [shape: f32[4,2,4,138], index: 0, kind: input, shape index: {}]   ;;  %s967_s1 = inlined_call_operand.vmem [shape: f32[8,72], index: 1, kind: input, shape index: {}]   ;;  %s968_s2 = inlined_call_operand.vmem [shape: f32[8,1], index: 2, kind: input, shape index: {}]   ;;  %s969_s3 = inlined_call_operand.hbm [shape: f32[2,8,128], index: 3, kind: output, shape index: {}]  }
   0x1   :  { %10 = vsyncpa [#allocation4 + $0x1], 0 }
   0x2   :  { %11 = vsyncpa [#allocation5], 0 }
   0x3   :  { %13 = vsyncpa [#allocation5 + $0x1], 0  ;;  %s795_s12 = smov 0   ;;  %s797_s13 = smov 0  }
   0x4   :  { %s799_s14 = smov 0   ;;  %s801_s15 = smov 0  }
   0x5   :  { %s803_s16 = smov 0   ;;  %s805_s17 = smov 0  }
   0x6 LB: > { %s525_s18 = sadd.s32 4294967295, %s762_s17   ;;  %s526_s19 = sadd.s32 4294967294, %s762_s17   ;;  %s762_s17 = sphi %s805_s17, %s19_s17   ;;  %s758_s16 = sphi %s803_s16, %s980_s16   ;;  %s754_s15 = sphi %s801_s15, %s979_s15   ;;  %s750_s14 = sphi %s799_s14, %s978_s14   ;;  %s746_s13 = sphi %s797_s13, %s977_s13   ;;  %s742_s12 = sphi %s795_s12, %s976_s12  }
   0x7   : > { %s31_s20 = sadd.s32 1, %s758_s16  ;;  %s38_s21 = sadd.s32 1, %s750_s14 }
   0x8   : > { %p33_p0 = scmp.ge.s32.totalorder %s31_s20, 2  ;;  %p45_p1 = scmp.ne.s32.totalorder %s750_s14, %s746_s13 }
   0x9   : > { %p46_p2 = scmp.eq.s32.totalorder %s762_s17, 0  ;;  %p51_p3 = scmp.ne.s32.totalorder %s746_s13, %s742_s12 }
   0xa   : > { %s982_s20 = smov (%p33_p0, %s31_s20), 0  ;;  %p52_p5 = scmp.eq.s32.totalorder %s525_s18, 0 }
   0xb   : > { %p836_p4 = por %p46_p2, %p45_p1  ;;  %s35_s23 = ssub.s32 %s758_s16, %s982_s20 }
   0xc   : > { %p129_p6 = scmp.eq.s32.totalorder %s525_s18, 1  ;;  %p36_p7 = scmp.eq.s32.totalorder %s35_s23, 0 }
   0xd   : > { %p842_p8 = por %p52_p5, %p51_p3  ;;  %p135_p10 = scmp.eq.s32.totalorder %s526_s19, 1 }
   0xe   : > { %p846_p9 = por %p129_p6, %p45_p1  ;;  %p591_p13 = scmp.lt.s32.totalorder %s762_s17, 2 }
   0xf   : > { %s851_s26 = scalar_select %p36_p7, %s750_s14, %s38_s21  }
  0x10   : > { %p853_p11 = por %p135_p10, %p51_p3  ;;  %s169_s28 = sand.u32 1, %s750_s14  }
  0x11   : > { %s531_s29 = sshll.u32 %s169_s28, 5  ;;  %s547_s30 = sshll.u32 %s758_s16, 7 }
  0x12   : > { %s179_s6 = scalar_lea.hbm %s966_s0, %s547_s30  ;;  %s173_s7 = scalar_lea.vmem [#allocation3], %s531_s29 }
  0x13   : > { %s180_s8 = sshll.u32 %s173_s7, 4  ;;  %p866_p0 = pnand %p591_p13, %p836_p4  ;;  %s181_s8 = int_to_ptr.vmem [resolvable:$true] %s180_s8 }
  0x14   : > { %s170_s10 = scalar_lea.sflag [#allocation4], %s169_s28  ;;  %s667_s11 = scalar_lea.vmem %s181_s8, 512 }
  0x15   : > { %p656_p1 = pneg %p866_p0  ;;  %p668_p2 = scmp.ne.s32.totalorder %s181_s8, %s667_s11 }
  0x16   : > { %s764_s18 = smov [#allocation3]  }
  0x17   : > { %p670_p3 = pnand %p668_p2, %p656_p1  ;;  %s672_s19 = sshll.u32 %s764_s18, 4  ;;  %s673_s19 = int_to_ptr.vmem [resolvable:$false] %s672_s19 }
  0x18   : > { %s674_s21 = scalar_lea.vmem %s673_s19, 1024  ;;  %p675_p6 = scmp.lt.s32.totalorder %s181_s8, %s673_s19 }
  0x19   : > { %p671_p5 = pneg %p670_p3  ;;  %p676_p7 = scmp.lt.s32.totalorder %s674_s21, %s667_s11 }
  0x1b   : > { %p677_p10 = por %p676_p7, %p675_p6 }
  0x1d   : > { %p678_p12 = pnand %p677_p10, %p671_p5 }
  0x1f   : > { %681 = shalt.err (!%p678_p12)
}
  0x20   : > { %s765_s22 = smov 256   ;;  %s766_s23 = smov 128  }
  0x21   : > { %s767_s28 = smov 8   ;;  %p534_p4 = scmp.ge.s32.totalorder %s762_s17, 1 }
  0x22   : > { %586 = dma.hbm_to_vmem [thread:$0]  (!%p866_p0), %s179_s6, 512, %s181_s8, %s170_s10, %s765_s22, %s766_s23, %s767_s28  }
  0x23   : > { %p188_p13 = scmp.lt.s32.totalorder %s762_s17, 3 }
  0x25   : > { %p189_p1 = pnand %p534_p4, %p188_p13 }
  0x26   : > { %s877_s29 = sand.u32 (!%p189_p1), 1, %s746_s13  }
  0x27   : > { %192 = sbr.rel (%p189_p1) target bundleno = 402 (0x192), region = 32  ;;  %s535_s30 = sshll.u32 (!%p189_p1), %s877_s29, 5 }
  0x28   : > { %s195_s4 = scalar_lea.sflag (!%p189_p1), [#allocation4], %s877_s29  ;;  %s881_s5 = scalar_lea.vmem (!%p189_p1), [#allocation3], %s535_s30 }
  0x2c   : > { %733 = dma.done.wait (%p842_p8), %s195_s4, 512  }
  0x2d   : > { %735 = vsyncadd (%p842_p8), %s195_s4, 4294966784  ;;  %v768_v0 = vmov 0.0   ;;  %v298_v1 = vld [vmem:[%s881_s5] sm:$0xff]  ;;  %v541_v2 = vld [vmem:[%s881_s5 + $0x8] sm:$0xff]  ;;  %s769_s24 = smov 118   ;;  %s770_s6 = smov 119  }
  0x2e   : > { %558 = vmatprep.subr.mxu0 %v768_v0  ;;  %239 = vst [vmem:[#allocation2 + $0x4] sm:$0xf] %v768_v0  ;;  %243 = vst [vmem:[#allocation2 + $0xc] sm:$0xf] %v768_v0  ;;  %301 = vrot.lane.b32.xlu0 %v298_v1, %s769_s24  ;;  %v300_v3 = vcombine.high %v298_v1, %v298_v1  ;;  %v289_v4 = vcombine.high %v541_v2, %v541_v2  ;;  %v539_v5 = vld [vmem:[%s881_s5 + $0x18] sm:$0xf] }
  0x2f   : > { %255 = vst [vmem:[#allocation2 + $0x14] sm:$0xf] %v768_v0  ;;  %259 = vst [vmem:[#allocation2 + $0x1c] sm:$0xf] %v768_v0  ;;  %290 = vrot.lane.b32.xlu1 %v541_v2, %s770_s6  ;;  %v538_v6 = vld [vmem:[%s881_s5 + $0x10] sm:$0xf] }
  0x30   : > { %263 = vst [vmem:[#allocation2 + $0x24] sm:$0xf] %v768_v0  ;;  %274 = vst [vmem:[#allocation2 + $0x2c] sm:$0xf] %v768_v0  ;;  %v540_v7 = vld [vmem:[%s881_s5 + $0x10] sm:$0xff]  ;;  %s771_s7 = smov 127  }
  0x31   : > { %286 = vst [vmem:[#allocation2 + $0x34] sm:$0xf] %v768_v0  ;;  %297 = vst [vmem:[#allocation2 + $0x3c] sm:$0xf] %v768_v0  ;;  %v537_v8 = vld [vmem:[%s881_s5 + $0x8] sm:$0xf]  ;;  %v266_v9 = vcombine.high %v540_v7, %v540_v7 }
  0x32   : > { %309 = vst [vmem:[#allocation2 + $0x44] sm:$0xf] %v768_v0  ;;  %262 = vst [vmem:[#allocation2 + $0x20] sm:$0xf] %v539_v5  ;;  %303 = vrot.lane.b32.xlu0 %v300_v3, %s769_s24  ;;  %v237_v10 = vld [vmem:[%s881_s5] sm:$0xf] }
  0x33   : > { %292 = vrot.lane.b32.xlu1 %v289_v4, %s770_s6  ;;  %258 = vst [vmem:[#allocation2 + $0x18] sm:$0xf] %v538_v6  ;;  %242 = vst [vmem:[#allocation2 + $0x8] sm:$0xf] %v537_v8  ;;  %vm772_vm0 = vmmov 0   ;;  %v320_v11 = vld [vmem:[%s968_s2] sm:$0xff] }
  0x34   : > { %238 = vst [vmem:[#allocation2] sm:$0xf] %v237_v10  ;;  %576 = vmatprep.mubr.msk.f32.mxu0 %vm772_vm0, %v768_v0  ;;  %v773_v12 = vmov 0   ;;  %vm305_vm1 = vcmask 965632   ;;  %vm282_vm2 = vcmask 973824   ;;  %vm251_vm3 = vcmask 1039360  }
  0x35   : > { %650 = vset.pattern.permute.xlu0 %v773_v12  ;;  %v310_v37 = vld [vmem:[%s967_s1] sm:$0xff]  ;;  %vm326_vm4 = vcmask 588800   ;;  %s536_s18 = sshll.u32 %s877_s29, 3  ;;  %s544_s19 = sshll.u32 %s754_s15, 7 }
  0x36   : > { %278 = vrot.lane.b32.xlu0 %v298_v1, %s770_s6  ;;  %s228_s21 = scalar_lea.vmem [#allocation6], %s536_s18  ;;  %s924_s30 = scalar_lea.hbm %s969_s3, %s544_s19 }
  0x37   : > { %280 = vrot.lane.b32.xlu1 %v300_v3, %s770_s6  ;;  %s416_s22 = sshll.u32 %s228_s21, 4  ;;  %s402_s4 = scalar_lea.sflag [#allocation5], %s877_s29  ;;  %s417_s22 = int_to_ptr.vmem [resolvable:$true] %s416_s22 }
  0x38   : > { %s682_s5 = scalar_lea.vmem %s417_s22, 128  ;;  %s774_s24 = smov [#allocation6]  }
  0x39   : > { %v315_v32 = vld [vmem:[#allocation2 + $0x20] sm:$0xff]  ;;  %p683_p8 = scmp.ne.s32.totalorder %s417_s22, %s682_s5  ;;  %s686_s15 = sshll.u32 %s774_s24, 4  ;;  %s687_s15 = int_to_ptr.vmem [resolvable:$false] %s686_s15 }
  0x3a   : > { %267 = vrot.lane.b32.xlu0 %v540_v7, %s771_s7  ;;  %v314_v33 = vld [vmem:[#allocation2 + $0x18] sm:$0xff]  ;;  %v312_v35 = vld [vmem:[#allocation2 + $0x8] sm:$0xff]  ;;  %s688_s6 = scalar_lea.vmem %s687_s15, 256  ;;  %p689_p2 = scmp.lt.s32.totalorder %s417_s22, %s687_s15 }
  0x3b   : > { %269 = vrot.lane.b32.xlu1 %v266_v9, %s771_s7  ;;  %v311_v36 = vld [vmem:[#allocation2] sm:$0xff]  ;;  %p684_p12 = pnand %p683_p8, %p846_p9  ;;  %p690_p3 = scmp.lt.s32.totalorder %s688_s6, %s682_s5 }
  0x3d   : > { %p685_p0 = pneg %p684_p12  ;;  %p691_p5 = por %p690_p3, %p689_p2 }
  0x3e   : > { %247 = vrot.lane.b32.xlu0 %v298_v1, %s771_s7 }
  0x3f   : > { %249 = vrot.lane.b32.xlu1 %v300_v3, %s771_s7  ;;  %p692_p6 = pnand %p691_p5, %p685_p0 }
  0x42   : > { %323 = vperm.xlu0 %650, %v320_v11  }
  0xa0   : > { %v302_v13 = vpop.permute.xlu0 %301 }
  0xa1   : > { %v291_v14 = vpop.permute.xlu1 %290 }
  0xa4   : > { %v304_v15 = vpop.permute.xlu0 %303 }
  0xa5   : > { %v293_v16 = vpop.permute.xlu1 %292  ;;  %v306_v17 = vsel %vm305_vm1, %v302_v13, %v304_v15 }
  0xa6   : > { %v294_v18 = vsel %vm282_vm2, %v291_v14, %v293_v16  ;;  %308 = vst [vmem:[#allocation2 + $0x40] sm:$0xf] %v306_v17 }
  0xa7   : > { %296 = vst [vmem:[#allocation2 + $0x38] sm:$0xf] %v294_v18 }
  0xa8   : > { %v279_v19 = vpop.permute.xlu0 %278 }
  0xa9   : > { %v281_v20 = vpop.permute.xlu1 %280 }
  0xaa   : > { %v283_v21 = vsel %vm282_vm2, %v279_v19, %v281_v20 }
  0xab   : > { %285 = vst [vmem:[#allocation2 + $0x30] sm:$0xf] %v283_v21 }
  0xac   : > { %v268_v22 = vpop.permute.xlu0 %267 }
  0xad   : > { %v270_v23 = vpop.permute.xlu1 %269  ;;  %v319_v25 = vld [vmem:[#allocation2 + $0x40] sm:$0xff] }
  0xae   : > { %v271_v24 = vsel %vm251_vm3, %v268_v22, %v270_v23  ;;  %559 = vmatpush3.msra.mxu0 %v319_v25  ;;  %v318_v26 = vld [vmem:[#allocation2 + $0x38] sm:$0xff] }
  0xaf   : > { %273 = vst [vmem:[#allocation2 + $0x28] sm:$0xf] %v271_v24  ;;  %560 = vmatprep.subr.mxu0 %v768_v0 }
  0xb0   : > { %561 = vmatpush3.msra.mxu0 %v318_v26  ;;  %v248_v27 = vpop.permute.xlu0 %247 }
  0xb1   : > { %v250_v28 = vpop.permute.xlu1 %249  ;;  %562 = vmatprep.subr.mxu0 %v768_v0 }
  0xb2   : > { %v317_v29 = vld [vmem:[#allocation2 + $0x30] sm:$0xff]  ;;  %v252_v30 = vsel %vm251_vm3, %v248_v27, %v250_v28 }
  0xb3   : > { %563 = vmatpush3.msra.mxu0 %v317_v29  ;;  %254 = vst [vmem:[#allocation2 + $0x10] sm:$0xf] %v252_v30 }
  0xb4   : > { %564 = vmatprep.subr.mxu0 %v768_v0 }
  0xb6   : > { %v316_v31 = vld [vmem:[#allocation2 + $0x28] sm:$0xff] }
  0xb7   : > { %565 = vmatpush3.msra.mxu0 %v316_v31 }
  0xb8   : > { %566 = vmatprep.subr.mxu0 %v768_v0 }
  0xb9   : > { %567 = vmatpush3.msra.mxu0 %v315_v32 }
  0xba   : > { %568 = vmatprep.subr.mxu0 %v768_v0  ;;  %v313_v34 = vld [vmem:[#allocation2 + $0x10] sm:$0xff] }
  0xbb   : > { %569 = vmatpush3.msra.mxu0 %v314_v33 }
  0xbc   : > { %570 = vmatprep.subr.mxu0 %v768_v0 }
  0xbd   : > { %571 = vmatpush3.msra.mxu0 %v313_v34  ;;  %v324_v38 = vpop.permute.xlu0 %323 }
  0xbe   : > { %572 = vmatprep.subr.mxu0 %v768_v0 }
  0xbf   : > { %573 = vmatpush3.msra.mxu0 %v312_v35 }
  0xc0   : > { %574 = vmatprep.subr.mxu0 %v768_v0 }
  0xc1   : > { %575 = vmatpush3.msra.mxu0 %v311_v36 }
  0xc2   : > { %577 = vmatmul.mubr.msk.f32.vlgmr.msra.gmra.mxu0 %vm326_vm4, %v310_v37 }
 0x182   : > { %v396_v39 = vpop.f32.mrf.mxu0 }
 0x183   : > { %v397_v40 = vadd.f32 %v396_v39, %v324_v38 }
 0x184   : > { %v578_v41 = vpop.f32.mrf.mxu0 }
 0x185   : > { %400 = vst [vmem:[%s228_s21] sm:$0xff] %v397_v40 }
 0x186   : > { %695 = shalt.err (!%p692_p6)
}
 0x187   : > { %s696_s7 = scalar_lea.hbm %s924_s30, 128  ;;  %s700_s9 = scalar_lea.hbm %s969_s3, 256 }
 0x188   : > { %p697_p7 = scmp.ne.s32.totalorder %s924_s30, %s696_s7  ;;  %p701_p13 = scmp.lt.s32.totalorder %s924_s30, %s969_s3 }
 0x189   : > { %p702_p1 = scmp.lt.s32.totalorder %s700_s9, %s696_s7 }
 0x18a   : > { %p698_p10 = pnand %p697_p7, %p846_p9 }
 0x18b   : > { %p703_p8 = por %p702_p1, %p701_p13 }
 0x18c   : > { %p699_p4 = pneg %p698_p10 }
 0x18e   : > { %p704_p12 = pnand %p703_p8, %p699_p4 }
 0x190   : > { %707 = shalt.err (!%p704_p12)
}
 0x191   : > { %581 = dma.vmem_to_hbm [thread:$0]  (%p846_p9), %s417_s22, 128, %s924_s30, %s402_s4  }
 0x192 PF: > { %s428_s18 = sand.u32 1, %s742_s12   ;;  %p975_p0 = scmp.ge.s32.totalorder %s762_s17, 2 }
 0x193   : > { %s429_s19 = scalar_lea.sflag [#allocation5], %s428_s18 }
 0x194   : > { %p588_p2 = pnand %p975_p0, %p853_p11 }
 0x196   : > { %p589_p3 = pneg %p588_p2 }
 0x198   : > { %737 = dma.done.wait (%p589_p3), %s429_s19, 128  }
 0x199   : > { %739 = vsyncadd (%p589_p3), %s429_s19, 4294967168  ;;  %s19_s17 = sadd.s32 1, %s762_s17   ;;  %s976_s12 = smov %s746_s13 }
 0x19a   : > { %p16_p5 = scmp.ge.s32.totalorder %s19_s17, 4   ;;  %s977_s13 = smov %s750_s14 }
 0x19b   : > { %s978_s14 = smov %s851_s26  ;;  %s979_s15 = smov %s758_s16 }
 0x19c   : > { %s980_s16 = smov %s982_s20  ;;  %18 = sbr.rel (!%p16_p5) target bundleno = 6 (0x6), region = 86 }
 0x1a1   :  { %434 = vsyncpa [#allocation4], 1 }
 0x1a2   :  { %436 = vsyncpa [#allocation4 + $0x1], 1 }
 0x1a3   :  { %437 = vsyncpa [#allocation5], 1 }
 0x1a4   :  { %439 = vsyncpa [#allocation5 + $0x1], 1 }

</bundles_post_ra>
